<compile_context>
chip_gen: v6e
topology: v6e:2x2x1
jax: 0.10.0
libtpu: 0.0.40
codegen_flags: <defaults>
</compile_context>

<pallas_src>
import math
from functools import partial

import jax
import jax.numpy as jnp
from jax.experimental import pallas as pl
from jax.experimental.pallas import tpu as pltpu

F32 = jnp.float32
BF16 = jnp.bfloat16


def _round_up(x, m):
    return (x + m - 1) // m * m


# ----------------------------------------------------------------------------
# Pallas kernels
# ----------------------------------------------------------------------------
def _mm_kernel(act, has_res, *refs):
    """Tiled matmul: acc(K) -> bias -> activation -> optional residual add."""
    if has_res:
        a_ref, w_ref, bias_ref, res_ref, o_ref, acc_ref = refs
    else:
        a_ref, w_ref, bias_ref, o_ref, acc_ref = refs
        res_ref = None
    k = pl.program_id(2)

    @pl.when(k == 0)
    def _():
        acc_ref[...] = jnp.zeros_like(acc_ref)

    acc_ref[...] += jnp.dot(a_ref[...], w_ref[...],
                            preferred_element_type=jnp.float32)

    @pl.when(k == pl.num_programs(2) - 1)
    def _():
        out = acc_ref[...] + bias_ref[...]
        if act == "relu":
            out = jnp.maximum(out, 0.0)
        if res_ref is not None:
            out = out + res_ref[...]
        o_ref[...] = out.astype(o_ref.dtype)


def pallas_matmul(a, w, b, act="none", residual=None):
    """out = act(a @ w + b) [+ residual].  a:(M,K) w:(K,N) b:(N,).

    bf16 MXU inputs, f32 accumulation.  M/N/K padded to lane-dense tiles and
    sliced back afterwards.
    """
    M, K = a.shape
    _, N = w.shape

    # Tile sizes (multiples of (8, 128); modest so double-buffering fits the
    # 32 MiB scoped VMEM default, incl. v7x's 64 MiB physical budget).
    m8 = _round_up(M, 8)
    if m8 >= 256:
        tm, Mp = 256, _round_up(M, 256)
    else:
        tm, Mp = m8, m8
    k128 = _round_up(K, 128)
    tk = 512 if k128 % 512 == 0 else (256 if k128 % 256 == 0 else 128)
    Kp = k128
    n128 = _round_up(N, 128)
    tn = 256 if n128 % 256 == 0 else 128
    Np = n128

    a_p = a.astype(BF16)
    if (Mp, Kp) != (M, K):
        a_p = jnp.pad(a_p, ((0, Mp - M), (0, Kp - K)))
    w_p = w.astype(BF16)
    if (Kp, Np) != (K, N):
        w_p = jnp.pad(w_p, ((0, Kp - K), (0, Np - N)))
    bias_p = b.astype(F32).reshape(1, N)
    if Np != N:
        bias_p = jnp.pad(bias_p, ((0, 0), (0, Np - N)))

    inputs = [a_p, w_p, bias_p]
    in_specs = [
        pl.BlockSpec((tm, tk), lambda i, j, k: (i, k)),
        pl.BlockSpec((tk, tn), lambda i, j, k: (k, j)),
        pl.BlockSpec((1, tn), lambda i, j, k: (0, j)),
    ]
    has_res = residual is not None
    if has_res:
        r_p = residual.astype(F32)
        if (Mp, Np) != (M, N):
            r_p = jnp.pad(r_p, ((0, Mp - M), (0, Np - N)))
        inputs.append(r_p)
        in_specs.append(pl.BlockSpec((tm, tn), lambda i, j, k: (i, j)))

    out = pl.pallas_call(
        partial(_mm_kernel, act, has_res),
        out_shape=jax.ShapeDtypeStruct((Mp, Np), F32),
        grid=(Mp // tm, Np // tn, Kp // tk),
        in_specs=in_specs,
        out_specs=pl.BlockSpec((tm, tn), lambda i, j, k: (i, j)),
        scratch_shapes=[pltpu.VMEM((tm, tn), jnp.float32)],
        compiler_params=pltpu.CompilerParams(
            dimension_semantics=("parallel", "parallel", "arbitrary")),
    )(*inputs)
    if (Mp, Np) != (M, N):
        out = out[:M, :N]
    return out


def _ln_kernel(eps, x_ref, g_ref, b_ref, o_ref):
    x = x_ref[...].astype(jnp.float32)
    mu = jnp.mean(x, axis=-1, keepdims=True)
    var = jnp.mean(jnp.square(x - mu), axis=-1, keepdims=True)
    y = (x - mu) * jax.lax.rsqrt(var + eps)
    o_ref[...] = (y * g_ref[...] + b_ref[...]).astype(o_ref.dtype)


def pallas_layernorm(x, g, b, eps=1e-6):
    """Row-tiled LayerNorm over the last axis."""
    shape = x.shape
    C = shape[-1]
    x2 = x.reshape(-1, C).astype(F32)
    M = x2.shape[0]
    m8 = _round_up(M, 8)
    if m8 >= 512:
        tm, Mp = 512, _round_up(M, 512)
    else:
        tm, Mp = m8, m8
    if Mp != M:
        x2 = jnp.pad(x2, ((0, Mp - M), (0, 0)))
    out = pl.pallas_call(
        partial(_ln_kernel, eps),
        out_shape=jax.ShapeDtypeStruct((Mp, C), F32),
        grid=(Mp // tm,),
        in_specs=[
            pl.BlockSpec((tm, C), lambda i: (i, 0)),
            pl.BlockSpec((1, C), lambda i: (0, 0)),
            pl.BlockSpec((1, C), lambda i: (0, 0)),
        ],
        out_specs=pl.BlockSpec((tm, C), lambda i: (i, 0)),
        compiler_params=pltpu.CompilerParams(dimension_semantics=("parallel",)),
    )(x2, g.reshape(1, C).astype(F32), b.reshape(1, C).astype(F32))
    if Mp != M:
        out = out[:M]
    return out.reshape(shape)


def _attn_kernel(num_heads, scale, q_ref, k_ref, v_ref, o_ref):
    """All heads of one batch element per grid step; heads split in-kernel."""
    C = q_ref.shape[-1]
    dh = C // num_heads
    q = q_ref[0].astype(jnp.float32)   # (N, C)
    k = k_ref[0].astype(jnp.float32)   # (M, C)
    v = v_ref[0].astype(jnp.float32)   # (M, C)
    outs = []
    for h in range(num_heads):
        qh = q[:, h * dh:(h + 1) * dh].astype(BF16)
        kh = k[:, h * dh:(h + 1) * dh].astype(BF16)
        vh = v[:, h * dh:(h + 1) * dh].astype(BF16)
        s = jax.lax.dot_general(qh, kh, (((1,), (1,)), ((), ())),
                                preferred_element_type=jnp.float32) * scale
        s = s - jnp.max(s, axis=-1, keepdims=True)
        p = jnp.exp(s)
        l = jnp.sum(p, axis=-1, keepdims=True)
        p = p * pl.reciprocal(l, approx=True)
        outs.append(jnp.dot(p.astype(BF16), vh,
                            preferred_element_type=jnp.float32))
    o_ref[0] = jnp.concatenate(outs, axis=-1).astype(o_ref.dtype)


def pallas_attention(q, k, v, num_heads, scale):
    """q:(B,N,C) k,v:(B,M,C) -> (B,N,C); one grid step per batch element."""
    # TODO(synk): flash-style KV tiling for very long sequences (large images).
    B, N, C = q.shape
    _, M, _ = k.shape
    return pl.pallas_call(
        partial(_attn_kernel, num_heads, scale),
        out_shape=jax.ShapeDtypeStruct((B, N, C), F32),
        grid=(B,),
        in_specs=[
            pl.BlockSpec((1, N, C), lambda i: (i, 0, 0)),
            pl.BlockSpec((1, M, C), lambda i: (i, 0, 0)),
            pl.BlockSpec((1, M, C), lambda i: (i, 0, 0)),
        ],
        out_specs=pl.BlockSpec((1, N, C), lambda i: (i, 0, 0)),
        compiler_params=pltpu.CompilerParams(dimension_semantics=("parallel",)),
    )(q.astype(F32), k.astype(F32), v.astype(F32))


def _dwconv_kernel(H, W, x_ref, w_ref, b_ref, o_ref):
    acc = jnp.zeros(o_ref.shape, jnp.float32)
    for kh in range(3):
        for kw in range(3):
            acc = acc + (x_ref[:, kh:kh + H, kw:kw + W, :].astype(jnp.float32)
                         * w_ref[kh * 3 + kw])
    o_ref[...] = (acc + b_ref[0]).astype(o_ref.dtype)


def pallas_dwconv3x3(x, w, b):
    """Depthwise 3x3 conv, stride 1, pad 1.  x:(B,H,W,C)  w:(9,C)  b:(C,).

    Tiled over (batch, channel); both axes parallel (megacore on v7x).
    """
    # TODO(synk): row-tiling with a 2-row halo for very large spatial sizes.
    B, H, W, C = x.shape
    xp = jnp.pad(x.astype(F32), ((0, 0), (1, 1), (1, 1), (0, 0)))
    tc = 128 if C % 128 == 0 else C
    return pl.pallas_call(
        partial(_dwconv_kernel, H, W),
        out_shape=jax.ShapeDtypeStruct((B, H, W, C), F32),
        grid=(B, C // tc),
        in_specs=[
            pl.BlockSpec((1, H + 2, W + 2, tc), lambda i, c: (i, 0, 0, c)),
            pl.BlockSpec((9, tc), lambda i, c: (0, c)),
            pl.BlockSpec((1, tc), lambda i, c: (0, c)),
        ],
        out_specs=pl.BlockSpec((1, H, W, tc), lambda i, c: (i, 0, 0, c)),
        compiler_params=pltpu.CompilerParams(
            dimension_semantics=("parallel", "parallel")),
    )(xp, w.astype(F32), b.reshape(1, C).astype(F32))


# ----------------------------------------------------------------------------
# Layer helpers (glue around the kernels)
# ----------------------------------------------------------------------------
def linear(x, p, act="none", residual=None):
    shape = x.shape
    Cout = p["w"].shape[1]
    r2 = None if residual is None else residual.reshape(-1, Cout)
    out = pallas_matmul(x.reshape(-1, shape[-1]), p["w"], p["b"],
                        act=act, residual=r2)
    return out.reshape(shape[:-1] + (Cout,))


def conv2d(x, p, stride, pad):
    """General conv via bf16 im2col + tiled Pallas matmul.  x NHWC."""
    # TODO(synk): move the im2col gather into the matmul kernel (K-axis taps).
    w, b = p["w"], p["b"]
    B, H, W, Cin = x.shape
    kh, kw, _, Cout = w.shape
    xp = jnp.pad(x.astype(BF16), ((0, 0), (pad, pad), (pad, pad), (0, 0)))
    OH = (H + 2 * pad - kh) // stride + 1
    OW = (W + 2 * pad - kw) // stride + 1
    cols = []
    for i in range(kh):
        for j in range(kw):
            cols.append(xp[:, i:i + stride * OH:stride, j:j + stride * OW:stride, :])
    patches = jnp.concatenate(cols, axis=-1).reshape(B * OH * OW, kh * kw * Cin)
    out = pallas_matmul(patches, w.reshape(kh * kw * Cin, Cout), b)
    return out.reshape(B, OH, OW, Cout)


def attention_fwd(x, H, W, p, num_heads, sr, residual):
    B, N, C = x.shape
    dh = C // num_heads
    if sr > 1:
        q = linear(x, p["q"])
        x_ = x.reshape(B, H, W, C)
        x_ = conv2d(x_, p["sr"], stride=sr, pad=0)
        Hs, Ws = x_.shape[1], x_.shape[2]
        x_ = x_.reshape(B, Hs * Ws, C)
        x_ = pallas_layernorm(x_, p["sr_norm"]["g"], p["sr_norm"]["b"])
        kv = linear(x_, p["kv"])                       # (B, M, 2C)
        k, v = kv[..., :C], kv[..., C:]
    else:
        # Fused q+kv projection: one lane-dense matmul of width 3C.
        w_qkv = jnp.concatenate([p["q"]["w"], p["kv"]["w"]], axis=1)
        b_qkv = jnp.concatenate([p["q"]["b"], p["kv"]["b"]], axis=0)
        qkv = pallas_matmul(x.reshape(B * N, C), w_qkv, b_qkv).reshape(B, N, 3 * C)
        q, k, v = qkv[..., :C], qkv[..., C:2 * C], qkv[..., 2 * C:]

    oh = pallas_attention(q, k, v, num_heads, dh ** -0.5)      # (B, N, C)
    # proj linear with the residual add fused into its epilogue.
    return linear(oh, p["proj"], residual=residual)


def mlp_fwd(x, H, W, p, residual):
    B, N, _ = x.shape
    h = linear(x, p["fc1"])
    hid = h.shape[-1]
    h = pallas_dwconv3x3(h.reshape(B, H, W, hid), p["dw"]["w"], p["dw"]["b"])
    # TODO(synk): fold exact-erf GELU into the dwconv epilogue once erf
    # lowering inside Mosaic is confirmed; kept in plain JAX for safety.
    h = jax.nn.gelu(h.reshape(B, N, hid), approximate=False)   # exact erf GELU
    # fc2 linear with the residual add fused into its epilogue.
    return linear(h, p["fc2"], residual=residual)


def block_fwd(x, H, W, p, num_heads, sr):
    xn = pallas_layernorm(x, p["norm1"]["g"], p["norm1"]["b"])
    x = attention_fwd(xn, H, W, p["attn"], num_heads, sr, residual=x)
    xn = pallas_layernorm(x, p["norm2"]["g"], p["norm2"]["b"])
    x = mlp_fwd(xn, H, W, p["mlp"], residual=x)
    return x


def backbone_fwd(x, params, cfg):
    feats = []
    for i in range(4):
        stg = params["stages"][i]
        ps, st = cfg["patch_sizes"][i], cfg["patch_strides"][i]
        x = conv2d(x, stg["patch_embed"]["conv"], stride=st, pad=ps // 2)
        B, H, W, C = x.shape
        x = x.reshape(B, H * W, C)
        x = pallas_layernorm(x, stg["patch_embed"]["norm"]["g"],
                             stg["patch_embed"]["norm"]["b"])
        for blk in stg["blocks"]:
            x = block_fwd(x, H, W, blk, cfg["num_heads"][i], cfg["sr_ratio"][i])
        x = pallas_layernorm(x, stg["norm"]["g"], stg["norm"]["b"])
        x = x.reshape(B, H, W, C)
        feats.append(x)
    return feats


def bilinear_resize(x, OH, OW):
    """PyTorch F.interpolate(mode='bilinear', align_corners=False) equivalent."""
    B, h, w, C = x.shape

    def idx(out, size):
        src = (jnp.arange(out, dtype=jnp.float32) + 0.5) * (size / out) - 0.5
        src = jnp.maximum(src, 0.0)
        i0 = jnp.minimum(jnp.floor(src).astype(jnp.int32), size - 1)
        i1 = jnp.minimum(i0 + 1, size - 1)
        return i0, i1, src - i0.astype(jnp.float32)

    y0, y1, ty = idx(OH, h)
    x0, x1, tx = idx(OW, w)
    top0, top1 = x[:, y0, :, :], x[:, y1, :, :]
    a, bq = top0[:, :, x0, :], top0[:, :, x1, :]
    c, d = top1[:, :, x0, :], top1[:, :, x1, :]
    ty = ty[None, :, None, None]
    tx = tx[None, None, :, None]
    top = a * (1 - tx) + bq * tx
    bot = c * (1 - tx) + d * tx
    return top * (1 - ty) + bot * ty


def head_fwd(feats, p, cfg):
    c1, c2, c3, c4 = feats
    B, H1, W1, _ = c1.shape
    E = cfg["dec_embed_dim"]
    outs = []
    for feat, lin in zip([c4, c3, c2, c1],
                         [p["linear_c"][3], p["linear_c"][2],
                          p["linear_c"][1], p["linear_c"][0]]):
        t = linear(feat, lin)
        if t.shape[1] != H1 or t.shape[2] != W1:
            t = bilinear_resize(t, H1, W1)
        outs.append(t)
    cat = jnp.concatenate(outs, axis=-1)          # (B, H1, W1, 4E)
    # linear_fuse = 1x1 conv (no bias) + BatchNorm2d (eval) + ReLU, folded in.
    # NOTE: BN fold assumes freshly-initialized running stats (mean=0, var=1).
    bn_scale = 1.0 / math.sqrt(1.0 + 1e-5)
    x = pallas_matmul(cat.reshape(-1, 4 * E), p["fuse_w"] * bn_scale,
                      jnp.zeros((E,), F32), act="relu").reshape(B, H1, W1, E)
    # Dropout2d(0.1): identity at inference.
    x = linear(x, p["pred"])                      # 1x1 conv with bias
    return x


def segformer_fwd(x_nchw, params, cfg):
    x = jnp.transpose(x_nchw, (0, 2, 3, 1)).astype(F32)      # NCHW -> NHWC
    feats = backbone_fwd(x, params, cfg)
    out = head_fwd(feats, params["head"], cfg)
    out = jnp.repeat(jnp.repeat(out, 4, axis=1), 4, axis=2)   # nearest x4
    return jnp.transpose(out, (0, 3, 1, 2))                   # -> NCHW


# ----------------------------------------------------------------------------
# Deterministic parameter initialization (mirrors SegFormer.init_weights)
# ----------------------------------------------------------------------------
class KeyGen:
    def __init__(self, seed):
        self.key = jax.random.PRNGKey(seed)

    def __call__(self):
        self.key, sub = jax.random.split(self.key)
        return sub


def init_linear(kg, fin, fout):
    return {"w": 0.02 * jax.random.normal(kg(), (fin, fout), F32),
            "b": jnp.zeros((fout,), F32)}


def init_ln(C):
    return {"g": jnp.ones((C,), F32), "b": jnp.zeros((C,), F32)}


def init_conv(kg, k, cin, cout, groups=1):
    std = math.sqrt(2.0 / (k * k * cout // groups))
    if groups == 1:
        w = std * jax.random.normal(kg(), (k, k, cin, cout), F32)
    else:  # depthwise (cin == cout == groups)
        w = std * jax.random.normal(kg(), (k * k, cout), F32)
    return {"w": w, "b": jnp.zeros((cout,), F32)}


def init_params(kg, cfg):
    params = {"stages": []}
    in_ch = cfg["in_chans"]
    for i in range(4):
        dim = cfg["embed_dims"][i]
        hid = dim * cfg["mlp_ratio"][i]
        stage = {
            "patch_embed": {"conv": init_conv(kg, cfg["patch_sizes"][i], in_ch, dim),
                            "norm": init_ln(dim)},
            "blocks": [],
            "norm": init_ln(dim),
        }
        for _ in range(cfg["depths"][i]):
            blk = {
                "norm1": init_ln(dim),
                "attn": {"q": init_linear(kg, dim, dim),
                         "kv": init_linear(kg, dim, 2 * dim),
                         "proj": init_linear(kg, dim, dim)},
                "norm2": init_ln(dim),
                "mlp": {"fc1": init_linear(kg, dim, hid),
                        "dw": init_conv(kg, 3, hid, hid, groups=hid),
                        "fc2": init_linear(kg, hid, dim)},
            }
            if cfg["sr_ratio"][i] > 1:
                blk["attn"]["sr"] = init_conv(kg, cfg["sr_ratio"][i], dim, dim)
                blk["attn"]["sr_norm"] = init_ln(dim)
            stage["blocks"].append(blk)
        params["stages"].append(stage)
        in_ch = dim

    E, NC = cfg["dec_embed_dim"], cfg["num_classes"]
    params["head"] = {
        "linear_c": [init_linear(kg, cfg["embed_dims"][j], E) for j in range(4)],
        # 1x1 conv, no bias (Conv2d init: std = sqrt(2 / fan_out))
        "fuse_w": math.sqrt(2.0 / E) * jax.random.normal(kg(), (4 * E, E), F32),
        "pred": {"w": math.sqrt(2.0 / NC) * jax.random.normal(kg(), (E, NC), F32),
                 "b": jnp.zeros((NC,), F32)},
    }
    return params


# ----------------------------------------------------------------------------
if __name__ == "__main__":
    cfg = dict(
        in_chans=3,
        img_size=64,
        embed_dims=[16, 32, 40, 64],
        num_heads=[1, 2, 5, 8],
        mlp_ratio=[4, 4, 4, 4],
        depths=[1, 1, 1, 1],
        sr_ratio=[8, 4, 2, 1],
        patch_sizes=[7, 3, 3, 3],
        patch_strides=[4, 2, 2, 2],
        dec_embed_dim=64,
        num_classes=19,
    )
    params = init_params(KeyGen(42), cfg)
    x = jax.random.normal(jax.random.PRNGKey(0), (2, 3, 64, 64), F32)  # NCHW

    out = segformer_fwd(x, params, cfg)
    out = jax.block_until_ready(out)
    assert out.shape == (2, cfg["num_classes"], 64, 64), out.shape
    assert jnp.all(jnp.isfinite(out))
    print("KERNEL_OK")
</pallas_src>

<mosaic_0001>
module attributes {stable_mosaic.version = 11 : i64} {
  func.func @_mm_kernel(%arg0: i32, %arg1: i32, %arg2: i32, %arg3: memref<256x256xbf16, #tpu.memory_space<vmem>>, %arg4: memref<256x128xbf16, #tpu.memory_space<vmem>>, %arg5: memref<1x128xf32, #tpu.memory_space<vmem>>, %arg6: memref<256x128xf32, #tpu.memory_space<vmem>>, %arg7: memref<256x128xf32, #tpu.memory_space<vmem>>) attributes {dimension_semantics = [#tpu.dimension_semantics<parallel>, #tpu.dimension_semantics<parallel>, #tpu.dimension_semantics<arbitrary>], iteration_bounds = array<i64: 2, 1, 1>, scalar_prefetch = 0 : i64, scratch_operands = 1 : i64, tpu.core_type = #tpu.core_type<tc>, window_params = [{transform_indices = @transform_0, window_bounds = array<i64: 256, 256>}, {transform_indices = @transform_1, window_bounds = array<i64: 256, 128>}, {transform_indices = @transform_2, window_bounds = array<i64: 1, 128>}, {transform_indices = @transform_3, window_bounds = array<i64: 256, 128>}]} {
    %c0_i32 = arith.constant 0 : i32
    %0 = arith.cmpi eq, %arg2, %c0_i32 : i32
    %1 = arith.extui %0 : i1 to i32
    %c0_i32_0 = arith.constant 0 : i32
    %2 = arith.cmpi ne, %1, %c0_i32_0 : i32
    scf.if %2 {
      %cst_10 = arith.constant 0.000000e+00 : f32
      %12 = vector.broadcast %cst_10 : f32 to vector<256x128xf32>
      %c0_11 = arith.constant 0 : index
      %c0_12 = arith.constant 0 : index
      %13 = vector.load %arg7[%c0_11, %c0_12] : memref<256x128xf32, #tpu.memory_space<vmem>>, vector<256x128xf32>
      tpu.vector_store %arg7[%c0_11, %c0_12], %12 {strides = array<i32>} : memref<256x128xf32, #tpu.memory_space<vmem>>, vector<256x128xf32>,
    } else {
    }
    %c0 = arith.constant 0 : index
    %c0_1 = arith.constant 0 : index
    %3 = vector.load %arg7[%c0, %c0_1] : memref<256x128xf32, #tpu.memory_space<vmem>>, vector<256x128xf32>
    %c0_2 = arith.constant 0 : index
    %c0_3 = arith.constant 0 : index
    %4 = vector.load %arg3[%c0_2, %c0_3] : memref<256x256xbf16, #tpu.memory_space<vmem>>, vector<256x256xbf16>
    %c0_4 = arith.constant 0 : index
    %c0_5 = arith.constant 0 : index
    %5 = vector.load %arg4[%c0_4, %c0_5] : memref<256x128xbf16, #tpu.memory_space<vmem>>, vector<256x128xbf16>
    %cst = arith.constant dense<0.000000e+00> : vector<256x128xf32>
    %6 = tpu.matmul %4, %5, %cst {dimension_numbers = #tpu.dot_dimension_numbers<[1], [0], [0], [1], [0, 0, 1, 1], [], []>} : vector<256x256xbf16>, vector<256x128xbf16>, vector<256x128xf32> -> vector<256x128xf32>
    %7 = arith.addf %3, %6 : vector<256x128xf32>
    %c0_6 = arith.constant 0 : index
    %c0_7 = arith.constant 0 : index
    %8 = vector.load %arg7[%c0_6, %c0_7] : memref<256x128xf32, #tpu.memory_space<vmem>>, vector<256x128xf32>
    tpu.vector_store %arg7[%c0_6, %c0_7], %7 {strides = array<i32>} : memref<256x128xf32, #tpu.memory_space<vmem>>, vector<256x128xf32>,
    %c0_i32_8 = arith.constant 0 : i32
    %9 = arith.cmpi eq, %arg2, %c0_i32_8 : i32
    %10 = arith.extui %9 : i1 to i32
    %c0_i32_9 = arith.constant 0 : i32
    %11 = arith.cmpi ne, %10, %c0_i32_9 : i32
    scf.if %11 {
      %c0_10 = arith.constant 0 : index
      %c0_11 = arith.constant 0 : index
      %12 = vector.load %arg7[%c0_10, %c0_11] : memref<256x128xf32, #tpu.memory_space<vmem>>, vector<256x128xf32>
      %c0_12 = arith.constant 0 : index
      %c0_13 = arith.constant 0 : index
      %13 = vector.load %arg5[%c0_12, %c0_13] : memref<1x128xf32, #tpu.memory_space<vmem>>, vector<1x128xf32>
      %14 = vector.broadcast %13 : vector<1x128xf32> to vector<256x128xf32>
      %15 = arith.addf %12, %14 : vector<256x128xf32>
      %c0_14 = arith.constant 0 : index
      %c0_15 = arith.constant 0 : index
      %16 = vector.load %arg6[%c0_14, %c0_15] : memref<256x128xf32, #tpu.memory_space<vmem>>, vector<256x128xf32>
      tpu.vector_store %arg6[%c0_14, %c0_15], %15 {strides = array<i32>} : memref<256x128xf32, #tpu.memory_space<vmem>>, vector<256x128xf32>,
    } else {
    }
    return
  }
  func.func @transform_0(%arg0: i32, %arg1: i32, %arg2: i32) -> (i32, i32) {
    %c0_i32 = arith.constant 0 : i32
    return %arg0, %arg2 : i32, i32
  }
  func.func @transform_1(%arg0: i32, %arg1: i32, %arg2: i32) -> (i32, i32) {
    %c0_i32 = arith.constant 0 : i32
    return %arg2, %arg1 : i32, i32
  }
  func.func @transform_2(%arg0: i32, %arg1: i32, %arg2: i32) -> (i32, i32) {
    %c0_i32 = arith.constant 0 : i32
    %c0_i32_0 = arith.constant 0 : i32
    return %c0_i32, %arg1 : i32, i32
  }
  func.func @transform_3(%arg0: i32, %arg1: i32, %arg2: i32) -> (i32, i32) {
    %c0_i32 = arith.constant 0 : i32
    return %arg0, %arg1 : i32, i32
  }
}

</mosaic_0001>

<bundles_post_ra>
// kernel: tpu_custom_call.1
= control target key start
LH: loop header
LB: loop body
LE: loop exit
PB: predicated region body
PF: predicated region fallthrough
CT: control target
= control target key end

     0   :  { %8 = vsyncpa [#allocation4], 0  ;;  %s1911_s0 = inlined_call_operand.hbm [shape: bf16[512,256], index: 0, kind: input, shape index: {}]   ;;  %s1912_s1 = inlined_call_operand.hbm [shape: bf16[256,128], index: 1, kind: input, shape index: {}]   ;;  %s1913_s2 = inlined_call_operand.vmem [shape: f32[1,128], index: 2, kind: input, shape index: {}]   ;;  %s1914_s3 = inlined_call_operand.hbm [shape: f32[512,128], index: 3, kind: output, shape index: {}]  }
   0x1   :  { %10 = vsyncpa [#allocation4 + $0x1], 0 }
   0x2   :  { %11 = vsyncpa [#allocation7], 0 }
   0x3   :  { %12 = vsyncpa [#allocation5], 0 }
   0x4   :  { %14 = vsyncpa [#allocation5 + $0x1], 0  ;;  %s1620_s12 = smov 0   ;;  %s1622_s13 = smov 0  }
   0x5   :  { %s1624_s14 = smov 0   ;;  %s1626_s15 = smov 0  }
   0x6   :  { %s1628_s16 = smov 0   ;;  %s1630_s17 = smov 0  }
   0x7 LB: > { %s1109_s18 = sadd.s32 4294967295, %s1589_s17   ;;  %s1110_s19 = sadd.s32 4294967294, %s1589_s17   ;;  %s1589_s17 = sphi %s1630_s17, %s20_s17   ;;  %s1585_s16 = sphi %s1628_s16, %s1932_s16   ;;  %s1581_s15 = sphi %s1626_s15, %s1931_s15   ;;  %s1577_s14 = sphi %s1624_s14, %s1930_s14   ;;  %s1573_s13 = sphi %s1622_s13, %s1929_s13   ;;  %s1569_s12 = sphi %s1620_s12, %s1928_s12  }
   0x8   : > { %p61_p0 = scmp.ne.s32.totalorder %s1573_s13, %s1569_s12  ;;  %p1654_p1 = scmp.eq.s32.totalorder %s1109_s18, 0 }
   0x9   : > { %p1658_p2 = scmp.eq.s32.totalorder %s1109_s18, 1  ;;  %p147_p3 = scmp.eq.s32.totalorder %s1110_s19, 1 }
   0xa   : > { %p1664_p4 = por %p1654_p1, %p61_p0  ;;  %p1111_p5 = scmp.ge.s32.totalorder %s1589_s17, 1 }
   0xb   : > { %p1669_p6 = por %p147_p3, %p61_p0  ;;  %p154_p7 = scmp.lt.s32.totalorder %s1589_s17, 3 }
   0xc   : > { %s1918_s22 = scalar_select %p1664_p4, 1, 0 }
   0xd   : > { %s1919_s23 = scalar_select %p1669_p6, 1, 0 }
   0xe   : > { %p1674_p8 = pnand %p1111_p5, %p154_p7  ;;  %s1591_s25 = smov [#allocation6]  }
   0xf   : > { %s170_s26 = sshll.u32 %s1591_s25, 4  ;;  %s39_s28 = sadd.s32 1, %s1585_s16  ;;  %s171_s26 = int_to_ptr.vmem [resolvable:$true] %s170_s26 }
  0x10   : > { %p1316_p9 = pneg %p1674_p8  ;;  %s1462_s29 = scalar_lea.vmem %s171_s26, 2048 }
  0x11   : > { %p1463_p13 = scmp.ne.s32.totalorder %s171_s26, %s1462_s29  ;;  %p1470_p5 = scmp.lt.s32.totalorder %s171_s26, %s171_s26 }
  0x12   : > { %p1683_p11 = pnand %p1316_p9, %p1654_p1  ;;  %p1471_p7 = scmp.lt.s32.totalorder %s1462_s29, %s1462_s29 }
  0x14   : > { %p1453_p12 = pneg %p1683_p11  ;;  %p1472_p6 = por %p1471_p7, %p1470_p5 }
  0x16   : > { %p1465_p0 = pnand %p1463_p13, %p1453_p12 }
  0x18   : > { %p1466_p3 = pneg %p1465_p0 }
  0x1a   : > { %p1473_p4 = pnand %p1472_p6, %p1466_p3 }
  0x1c   : > { %1476 = shalt.err (!%p1473_p4)
}
  0x1d   : > { %s1592_s30 = smov 64   ;;  %s1593_s4 = smov 4  }
  0x1e   : > { %1319 = dma.hbm_to_vmem [thread:$0]  (!%p1683_p11), %s1912_s1, 2048, %s171_s26, [#allocation7], %s1592_s30, %s1592_s30, %s1593_s4  }
  0x1f   : > { %p41_p6 = scmp.ge.s32.totalorder %s39_s28, 2  ;;  %s48_s7 = sadd.s32 1, %s1577_s14 }
  0x20   : > { %p55_p4 = scmp.ne.s32.totalorder %s1577_s14, %s1573_s13  ;;  %p56_p9 = scmp.eq.s32.totalorder %s1589_s17, 0 }
  0x21   : > { %s1934_s28 = smov (%p41_p6, %s39_s28), 0  ;;  %p1329_p0 = scmp.lt.s32.totalorder %s1589_s17, 2 }
  0x22   : > { %p1701_p12 = por %p56_p9, %p55_p4  ;;  %p1707_p13 = por %p1658_p2, %p55_p4 }
  0x23   : > { %s43_s10 = ssub.s32 %s1585_s16, %s1934_s28  ;;  %s190_s11 = sand.u32 1, %s1577_s14  }
  0x24   : > { %p46_p11 = scmp.eq.s32.totalorder %s43_s10, 0  ;;  %s1115_s18 = sshll.u32 %s190_s11, 8 }
  0x25   : > { %s1178_s25 = sshll.u32 %s1585_s16, 12  ;;  %s194_s30 = scalar_lea.vmem [#allocation3], %s1115_s18 }
  0x26   : > { %s1716_s19 = scalar_select %p46_p11, %s1577_s14, %s48_s7  }
  0x27   : > { %s203_s29 = scalar_lea.hbm %s1911_s0, %s1178_s25  ;;  %s204_s4 = sshll.u32 %s194_s30, 4  ;;  %s205_s4 = int_to_ptr.vmem [resolvable:$true] %s204_s4 }
  0x28   : > { %p1724_p2 = pnand %p1329_p0, %p1701_p12  ;;  %s191_s5 = scalar_lea.sflag [#allocation4], %s190_s11 }
  0x29   : > { %s1490_s6 = scalar_lea.vmem %s205_s4, 4096  ;;  %s1594_s7 = smov [#allocation3]  }
  0x2a   : > { %p1479_p3 = pneg %p1724_p2  ;;  %p1491_p5 = scmp.ne.s32.totalorder %s205_s4, %s1490_s6 }
  0x2b   : > { %s1495_s10 = sshll.u32 %s1594_s7, 4  ;;  %s1496_s10 = int_to_ptr.vmem [resolvable:$false] %s1495_s10 }
  0x2c   : > { %p1493_p7 = pnand %p1491_p5, %p1479_p3  ;;  %s1497_s25 = scalar_lea.vmem %s1496_s10, 8192 }
  0x2d   : > { %p1498_p4 = scmp.lt.s32.totalorder %s205_s4, %s1496_s10  ;;  %p1499_p9 = scmp.lt.s32.totalorder %s1497_s25, %s1490_s6 }
  0x2e   : > { %p1494_p6 = pneg %p1493_p7 }
  0x2f   : > { %p1500_p11 = por %p1499_p9, %p1498_p4 }
  0x31   : > { %p1501_p10 = pnand %p1500_p11, %p1494_p6 }
  0x33   : > { %1504 = shalt.err (!%p1501_p10)
}
  0x34   : > { %s1595_s8 = smov 128   ;;  %s1596_s18 = smov 8  }
  0x35   : > { %1323 = dma.hbm_to_vmem [thread:$0]  (!%p1724_p2), %s203_s29, 4096, %s205_s4, %s191_s5, %s1595_s8, %s1595_s8, %s1596_s18  }
  0x36   : > { %216 = sbr.rel (%p1674_p8) target bundleno = 368 (0x170), region = 32  ;;  %s1735_s11 = sand.u32 (!%p1674_p8), 1, %s1573_s13  }
  0x37   : > { %s1120_s26 = sshll.u32 (!%p1674_p8), %s1735_s11, 8  ;;  %s219_s27 = scalar_lea.sflag (!%p1674_p8), [#allocation4], %s1735_s11 }
  0x38   : > { %s1741_s30 = scalar_lea.vmem (!%p1674_p8), [#allocation3], %s1120_s26  ;;  %p1925_p10 = scmp.ne.s32.totalorder (!%p1674_p8), %s1918_s22, 0 }
  0x3b   : > { %1556 = dma.done.wait (%p1925_p10), %s219_s27, 4096  }
  0x3c   : > { %1558 = vsyncadd (%p1925_p10), %s219_s27, 4294963200 }
  0x3d   : > { %1560 = dma.done.wait (%p1654_p1), [#allocation7], 2048  }
  0x3e   : > { %1562 = vsyncadd (%p1654_p1), [#allocation7], 4294965248  ;;  %v1387_v0 = vld [vmem:[#allocation6 + $0x78] sm:$0xff]   ;;  %v1389_v2 = vld [vmem:[#allocation6 + $0x70] sm:$0xff]   ;;  %s1792_s24 = scalar_lea.vmem [#allocation8], %s1120_s26  ;;  %s1179_s29 = sshll.u32 %s1581_s15, 12 }
  0x3f   : > { %v1388_v1 = vld [vmem:[#allocation6 + $0x38] sm:$0xff]   ;;  %1180 = vmatprep.subr.bf16.mxu0 %v1387_v0  ;;  %1292 = vmatprep.subr.bf16.mxu1 %v1387_v0  ;;  %v1390_v3 = vld [vmem:[#allocation6 + $0x30] sm:$0xff]   ;;  %v1391_v4 = vld [vmem:[#allocation6 + $0x68] sm:$0xff]   ;;  %s994_s4 = sshll.u32 %s1792_s24, 4  ;;  %s1857_s6 = scalar_lea.hbm %s1914_s3, %s1179_s29  ;;  %s1859_s4 = int_to_ptr.vmem [resolvable:$true] %s994_s4 }
  0x40   : > { %1181 = vmatpush3.bf16.msra.mxu0 %v1388_v1  ;;  %1300 = vmatpush3.bf16.msra.mxu1 %v1388_v1  ;;  %v1392_v5 = vld [vmem:[#allocation6 + $0x28] sm:$0xff]   ;;  %v1393_v6 = vld [vmem:[#allocation6 + $0x60] sm:$0xff]   ;;  %v1395_v8 = vld [vmem:[#allocation6 + $0x58] sm:$0xff]   ;;  %s980_s15 = scalar_lea.sflag [#allocation5], %s1735_s11  ;;  %s1505_s7 = scalar_lea.vmem %s1859_s4, 4096 }
  0x41   : > { %1182 = vmatprep.subr.bf16.mxu0 %v1389_v2  ;;  %1293 = vmatprep.subr.bf16.mxu1 %v1389_v2  ;;  %v1394_v7 = vld [vmem:[#allocation6 + $0x20] sm:$0xff]   ;;  %v1396_v9 = vld [vmem:[#allocation6 + $0x18] sm:$0xff]   ;;  %v1397_v10 = vld [vmem:[#allocation6 + $0x50] sm:$0xff]   ;;  %p1506_p1 = scmp.ne.s32.totalorder %s1859_s4, %s1505_s7  ;;  %s1597_s10 = smov [#allocation8]  }
  0x42   : > { %v1405_v11 = vld [vmem:[%s1741_s30 + $0x4] ss:$8 sps:$4 sm:$0xff]   ;;  %v1398_v13 = vld [vmem:[#allocation6 + $0x10] sm:$0xff]   ;;  %v1403_v18 = vld [vmem:[%s1741_s30] ss:$8 sps:$4 sm:$0xff]   ;;  %s1509_s25 = sshll.u32 %s1597_s10, 4  ;;  %s1510_s25 = int_to_ptr.vmem [resolvable:$false] %s1509_s25 }
  0x43   : > { %v1408_v12 = vld [vmem:[%s1741_s30 + $0x84] ss:$8 sps:$4 sm:$0xff]   ;;  %680 = vmatprep.mubr.bf16.mxu0 %v1405_v11  ;;  %v1406_v19 = vld [vmem:[%s1741_s30 + $0x80] ss:$8 sps:$4 sm:$0xff]   ;;  %v1409_v20 = vld [vmem:[%s1741_s30 + $0x14] ss:$8 sps:$4 sm:$0xff]   ;;  %p1507_p8 = pnand %p1506_p1, %p1707_p13  ;;  %p1512_p0 = scmp.lt.s32.totalorder %s1859_s4, %s1510_s25 }
  0x44   : > { %1183 = vmatpush3.bf16.msra.mxu0 %v1390_v3  ;;  %1301 = vmatpush3.bf16.msra.mxu1 %v1390_v3  ;;  %v1399_v14 = vld [vmem:[#allocation6 + $0x48] sm:$0xff]   ;;  %v1401_v16 = vld [vmem:[#allocation6 + $0x40] sm:$0xff]   ;;  %v1411_v21 = vld [vmem:[%s1741_s30 + $0x94] ss:$8 sps:$4 sm:$0xff]   ;;  %s1511_s8 = scalar_lea.vmem %s1510_s25, 8192 }
  0x45   : > { %1184 = vmatprep.subr.bf16.mxu0 %v1391_v4  ;;  %1294 = vmatprep.subr.bf16.mxu1 %v1391_v4  ;;  %v1400_v15 = vld [vmem:[#allocation6 + $0x8] sm:$0xff]   ;;  %v1402_v17 = vld [vmem:[#allocation6] sm:$0xff]   ;;  %v1413_v22 = vld [vmem:[%s1741_s30 + $0x10] ss:$8 sps:$4 sm:$0xff]   ;;  %p1508_p12 = pneg %p1507_p8  ;;  %p1513_p2 = scmp.lt.s32.totalorder %s1511_s8, %s1505_s7 }
  0x46   : > { %744 = vmatprep.mubr.bf16.mxu1 %v1408_v12  ;;  %v1414_v23 = vld [vmem:[%s1741_s30 + $0x90] ss:$8 sps:$4 sm:$0xff]   ;;  %v1415_v24 = vld [vmem:[%s1741_s30 + $0x24] ss:$8 sps:$4 sm:$0xff]   ;;  %v1419_v26 = vld [vmem:[%s1741_s30 + $0x20] ss:$8 sps:$4 sm:$0xff]  }
  0x47   : > { %v1417_v25 = vld [vmem:[%s1741_s30 + $0xa4] ss:$8 sps:$4 sm:$0xff]   ;;  %v1420_v27 = vld [vmem:[%s1741_s30 + $0xa0] ss:$8 sps:$4 sm:$0xff]   ;;  %v1421_v28 = vld [vmem:[%s1741_s30 + $0x34] ss:$8 sps:$4 sm:$0xff]   ;;  %p1514_p3 = por %p1513_p2, %p1512_p0 }
  0x48   : > { %1185 = vmatpush3.bf16.msra.mxu0 %v1392_v5  ;;  %1302 = vmatpush3.bf16.msra.mxu1 %v1392_v5  ;;  %v1423_v29 = vld [vmem:[%s1741_s30 + $0xb4] ss:$8 sps:$4 sm:$0xff]   ;;  %v1425_v30 = vld [vmem:[%s1741_s30 + $0x30] ss:$8 sps:$4 sm:$0xff]   ;;  %v1427_v32 = vld [vmem:[%s1741_s30 + $0x44] ss:$8 sps:$4 sm:$0xff]  }
  0x49   : > { %1186 = vmatprep.subr.bf16.mxu0 %v1393_v6  ;;  %1295 = vmatprep.subr.bf16.mxu1 %v1393_v6  ;;  %v1426_v31 = vld [vmem:[%s1741_s30 + $0xb0] ss:$8 sps:$4 sm:$0xff]   ;;  %v1429_v33 = vld [vmem:[%s1741_s30 + $0xc4] ss:$8 sps:$4 sm:$0xff]   ;;  %v1431_v34 = vld [vmem:[%s1741_s30 + $0x40] ss:$8 sps:$4 sm:$0xff]   ;;  %p1515_p5 = pnand %p1514_p3, %p1508_p12 }
  0x4a   : > { %v1432_v35 = vld [vmem:[%s1741_s30 + $0xc0] ss:$8 sps:$4 sm:$0xff]   ;;  %v1433_v36 = vld [vmem:[%s1741_s30 + $0x54] ss:$8 sps:$4 sm:$0xff]   ;;  %v1437_v38 = vld [vmem:[%s1741_s30 + $0x50] ss:$8 sps:$4 sm:$0xff]  }
  0x4b   : > { %v1435_v37 = vld [vmem:[%s1741_s30 + $0xd4] ss:$8 sps:$4 sm:$0xff]   ;;  %v1438_v39 = vld [vmem:[%s1741_s30 + $0xd0] ss:$8 sps:$4 sm:$0xff]   ;;  %v1439_v40 = vld [vmem:[%s1741_s30 + $0x64] ss:$8 sps:$4 sm:$0xff]  }
  0x4c   : > { %1187 = vmatpush3.bf16.msra.mxu0 %v1394_v7  ;;  %1303 = vmatpush3.bf16.msra.mxu1 %v1394_v7  ;;  %v1441_v41 = vld [vmem:[%s1741_s30 + $0xe4] ss:$8 sps:$4 sm:$0xff]   ;;  %v1443_v42 = vld [vmem:[%s1741_s30 + $0x60] ss:$8 sps:$4 sm:$0xff]   ;;  %v1445_v44 = vld [vmem:[%s1741_s30 + $0x74] ss:$8 sps:$4 sm:$0xff]  }
  0x4d   : > { %1188 = vmatprep.subr.bf16.mxu0 %v1395_v8  ;;  %1296 = vmatprep.subr.bf16.mxu1 %v1395_v8  ;;  %v1444_v43 = vld [vmem:[%s1741_s30 + $0xe0] ss:$8 sps:$4 sm:$0xff]   ;;  %v1447_v45 = vld [vmem:[%s1741_s30 + $0xf4] ss:$8 sps:$4 sm:$0xff]   ;;  %v1449_v46 = vld [vmem:[%s1741_s30 + $0x70] ss:$8 sps:$4 sm:$0xff]  }
  0x4e   : > { %v1450_v47 = vld [vmem:[%s1741_s30 + $0xf0] ss:$8 sps:$4 sm:$0xff]   ;;  %v1786_v51 = vld [vmem:[%s1913_s2] ss:$0 sm:$0xff] }
  0x50   : > { %1189 = vmatpush3.bf16.msra.mxu0 %v1396_v9  ;;  %1304 = vmatpush3.bf16.msra.mxu1 %v1396_v9 }
  0x51   : > { %1190 = vmatprep.subr.bf16.mxu0 %v1397_v10  ;;  %1297 = vmatprep.subr.bf16.mxu1 %v1397_v10 }
  0x54   : > { %1191 = vmatpush3.bf16.msra.mxu0 %v1398_v13  ;;  %1305 = vmatpush3.bf16.msra.mxu1 %v1398_v13 }
  0x55   : > { %1192 = vmatprep.subr.bf16.mxu0 %v1399_v14  ;;  %1298 = vmatprep.subr.bf16.mxu1 %v1399_v14 }
  0x58   : > { %1193 = vmatpush3.bf16.msra.mxu0 %v1400_v15  ;;  %1306 = vmatpush3.bf16.msra.mxu1 %v1400_v15 }
  0x59   : > { %1194 = vmatprep.subr.bf16.mxu0 %v1401_v16  ;;  %1299 = vmatprep.subr.bf16.mxu1 %v1401_v16 }
  0x5c   : > { %1195 = vmatpush3.bf16.msra.mxu0 %v1402_v17  ;;  %1307 = vmatpush3.bf16.msra.mxu1 %v1402_v17 }
  0x5f   : > { %681 = vmatmul.mubr.bf16.vlgmr.msra.gmra.mxu0 %v1403_v18  ;;  %745 = vmatmul.mubr.bf16.vlgmr.msra.gmra.mxu1 %v1406_v19 }
  0x60   : > { %688 = vmatprep.mubr.bf16.mxu0 %v1409_v20  ;;  %752 = vmatprep.mubr.bf16.mxu1 %v1411_v21 }
  0x67   : > { %689 = vmatmul.mubr.bf16.gmra.mxu0 %v1413_v22  ;;  %753 = vmatmul.mubr.bf16.gmra.mxu1 %v1414_v23 }
  0x68   : > { %696 = vmatprep.mubr.bf16.mxu0 %v1415_v24  ;;  %760 = vmatprep.mubr.bf16.mxu1 %v1417_v25 }
  0x6f   : > { %697 = vmatmul.mubr.bf16.gmra.mxu0 %v1419_v26  ;;  %761 = vmatmul.mubr.bf16.gmra.mxu1 %v1420_v27 }
  0x70   : > { %704 = vmatprep.mubr.bf16.mxu0 %v1421_v28  ;;  %768 = vmatprep.mubr.bf16.mxu1 %v1423_v29 }
  0x77   : > { %705 = vmatmul.mubr.bf16.gmra.mxu0 %v1425_v30  ;;  %769 = vmatmul.mubr.bf16.gmra.mxu1 %v1426_v31 }
  0x78   : > { %712 = vmatprep.mubr.bf16.mxu0 %v1427_v32  ;;  %776 = vmatprep.mubr.bf16.mxu1 %v1429_v33 }
  0x7f   : > { %713 = vmatmul.mubr.bf16.gmra.mxu0 %v1431_v34  ;;  %777 = vmatmul.mubr.bf16.gmra.mxu1 %v1432_v35 }
  0x80   : > { %720 = vmatprep.mubr.bf16.mxu0 %v1433_v36  ;;  %784 = vmatprep.mubr.bf16.mxu1 %v1435_v37 }
  0x87   : > { %721 = vmatmul.mubr.bf16.gmra.mxu0 %v1437_v38  ;;  %785 = vmatmul.mubr.bf16.gmra.mxu1 %v1438_v39 }
  0x88   : > { %728 = vmatprep.mubr.bf16.mxu0 %v1439_v40  ;;  %792 = vmatprep.mubr.bf16.mxu1 %v1441_v41 }
  0x8f   : > { %729 = vmatmul.mubr.bf16.gmra.mxu0 %v1443_v42  ;;  %793 = vmatmul.mubr.bf16.gmra.mxu1 %v1444_v43 }
  0x90   : > { %736 = vmatprep.mubr.bf16.mxu0 %v1445_v44  ;;  %800 = vmatprep.mubr.bf16.mxu1 %v1447_v45 }
  0x97   : > { %737 = vmatmul.mubr.bf16.gmra.mxu0 %v1449_v46  ;;  %801 = vmatmul.mubr.bf16.gmra.mxu1 %v1450_v47 }
 0x11f   : > { %v1196_v48 = vpop.f32.mrf.mxu0  ;;  %v1244_v49 = vpop.f32.mrf.mxu1 }
 0x121   : > { %v1197_v50 = vpop.f32.mrf.mxu0  ;;  %v1245_v52 = vpop.f32.mrf.mxu1 }
 0x122   : > { %v1198_v53 = vadd.f32 %v1197_v50, %v1196_v48  ;;  %v1246_v54 = vadd.f32 %v1245_v52, %v1244_v49 }
 0x123   : > { %v1199_v55 = vpop.f32.mrf.mxu0  ;;  %v1247_v56 = vpop.f32.mrf.mxu1 }
 0x124   : > { %v915_v57 = vadd.f32 %v1198_v53, %v1786_v51  ;;  %v931_v58 = vadd.f32 %v1246_v54, %v1786_v51 }
 0x125   : > { %v1200_v59 = vpop.f32.mrf.mxu0  ;;  %v1248_v60 = vpop.f32.mrf.mxu1 }
 0x126   : > { %947 = vst [vmem:[%s1792_s24] sm:$0xff] %v915_v57  ;;  %963 = vst [vmem:[%s1792_s24 + $0x80] sm:$0xff] %v931_v58  ;;  %v1201_v61 = vadd.f32 %v1200_v59, %v1199_v55  ;;  %v1249_v62 = vadd.f32 %v1248_v60, %v1247_v56 }
 0x127   : > { %v1202_v63 = vpop.f32.mrf.mxu0  ;;  %v1250_v0 = vpop.f32.mrf.mxu1 }
 0x128   : > { %v916_v1 = vadd.f32 %v1201_v61, %v1786_v51  ;;  %v932_v2 = vadd.f32 %v1249_v62, %v1786_v51 }
 0x129   : > { %v1203_v3 = vpop.f32.mrf.mxu0  ;;  %v1251_v4 = vpop.f32.mrf.mxu1 }
 0x12a   : > { %948 = vst [vmem:[%s1792_s24 + $0x8] sm:$0xff] %v916_v1  ;;  %964 = vst [vmem:[%s1792_s24 + $0x88] sm:$0xff] %v932_v2  ;;  %v1204_v5 = vadd.f32 %v1203_v3, %v1202_v63  ;;  %v1252_v6 = vadd.f32 %v1251_v4, %v1250_v0 }
 0x12b   : > { %v1205_v7 = vpop.f32.mrf.mxu0  ;;  %v1253_v8 = vpop.f32.mrf.mxu1 }
 0x12c   : > { %v917_v9 = vadd.f32 %v1204_v5, %v1786_v51  ;;  %v933_v10 = vadd.f32 %v1252_v6, %v1786_v51 }
 0x12d   : > { %v1206_v11 = vpop.f32.mrf.mxu0  ;;  %v1254_v12 = vpop.f32.mrf.mxu1 }
 0x12e   : > { %949 = vst [vmem:[%s1792_s24 + $0x10] sm:$0xff] %v917_v9  ;;  %965 = vst [vmem:[%s1792_s24 + $0x90] sm:$0xff] %v933_v10  ;;  %v1207_v13 = vadd.f32 %v1206_v11, %v1205_v7  ;;  %v1255_v14 = vadd.f32 %v1254_v12, %v1253_v8 }
 0x12f   : > { %v1208_v15 = vpop.f32.mrf.mxu0  ;;  %v1256_v16 = vpop.f32.mrf.mxu1 }
 0x130   : > { %v918_v17 = vadd.f32 %v1207_v13, %v1786_v51  ;;  %v934_v18 = vadd.f32 %v1255_v14, %v1786_v51 }
 0x131   : > { %v1209_v19 = vpop.f32.mrf.mxu0  ;;  %v1257_v20 = vpop.f32.mrf.mxu1 }
 0x132   : > { %950 = vst [vmem:[%s1792_s24 + $0x18] sm:$0xff] %v918_v17  ;;  %966 = vst [vmem:[%s1792_s24 + $0x98] sm:$0xff] %v934_v18  ;;  %v1210_v21 = vadd.f32 %v1209_v19, %v1208_v15  ;;  %v1258_v22 = vadd.f32 %v1257_v20, %v1256_v16 }
 0x133   : > { %v1211_v23 = vpop.f32.mrf.mxu0  ;;  %v1259_v24 = vpop.f32.mrf.mxu1 }
 0x134   : > { %v919_v25 = vadd.f32 %v1210_v21, %v1786_v51  ;;  %v935_v26 = vadd.f32 %v1258_v22, %v1786_v51 }
 0x135   : > { %v1212_v27 = vpop.f32.mrf.mxu0  ;;  %v1260_v28 = vpop.f32.mrf.mxu1 }
 0x136   : > { %951 = vst [vmem:[%s1792_s24 + $0x20] sm:$0xff] %v919_v25  ;;  %967 = vst [vmem:[%s1792_s24 + $0xa0] sm:$0xff] %v935_v26  ;;  %v1213_v29 = vadd.f32 %v1212_v27, %v1211_v23  ;;  %v1261_v30 = vadd.f32 %v1260_v28, %v1259_v24 }
 0x137   : > { %v1214_v31 = vpop.f32.mrf.mxu0  ;;  %v1262_v32 = vpop.f32.mrf.mxu1 }
 0x138   : > { %v920_v33 = vadd.f32 %v1213_v29, %v1786_v51  ;;  %v936_v34 = vadd.f32 %v1261_v30, %v1786_v51 }
 0x139   : > { %v1215_v35 = vpop.f32.mrf.mxu0  ;;  %v1263_v36 = vpop.f32.mrf.mxu1 }
 0x13a   : > { %952 = vst [vmem:[%s1792_s24 + $0x28] sm:$0xff] %v920_v33  ;;  %968 = vst [vmem:[%s1792_s24 + $0xa8] sm:$0xff] %v936_v34  ;;  %v1216_v37 = vadd.f32 %v1215_v35, %v1214_v31  ;;  %v1264_v38 = vadd.f32 %v1263_v36, %v1262_v32 }
 0x13b   : > { %v1217_v39 = vpop.f32.mrf.mxu0  ;;  %v1265_v40 = vpop.f32.mrf.mxu1 }
 0x13c   : > { %v921_v41 = vadd.f32 %v1216_v37, %v1786_v51  ;;  %v937_v42 = vadd.f32 %v1264_v38, %v1786_v51 }
 0x13d   : > { %v1218_v43 = vpop.f32.mrf.mxu0  ;;  %v1266_v44 = vpop.f32.mrf.mxu1 }
 0x13e   : > { %953 = vst [vmem:[%s1792_s24 + $0x30] sm:$0xff] %v921_v41  ;;  %969 = vst [vmem:[%s1792_s24 + $0xb0] sm:$0xff] %v937_v42  ;;  %v1219_v45 = vadd.f32 %v1218_v43, %v1217_v39  ;;  %v1267_v46 = vadd.f32 %v1266_v44, %v1265_v40 }
 0x13f   : > { %v1220_v47 = vpop.f32.mrf.mxu0  ;;  %v1268_v48 = vpop.f32.mrf.mxu1 }
 0x140   : > { %v922_v49 = vadd.f32 %v1219_v45, %v1786_v51  ;;  %v938_v50 = vadd.f32 %v1267_v46, %v1786_v51 }
 0x141   : > { %v1221_v52 = vpop.f32.mrf.mxu0  ;;  %v1269_v53 = vpop.f32.mrf.mxu1 }
 0x142   : > { %954 = vst [vmem:[%s1792_s24 + $0x38] sm:$0xff] %v922_v49  ;;  %970 = vst [vmem:[%s1792_s24 + $0xb8] sm:$0xff] %v938_v50  ;;  %v1222_v54 = vadd.f32 %v1221_v52, %v1220_v47  ;;  %v1270_v55 = vadd.f32 %v1269_v53, %v1268_v48 }
 0x143   : > { %v1223_v56 = vpop.f32.mrf.mxu0  ;;  %v1271_v57 = vpop.f32.mrf.mxu1 }
 0x144   : > { %v923_v58 = vadd.f32 %v1222_v54, %v1786_v51  ;;  %v939_v59 = vadd.f32 %v1270_v55, %v1786_v51 }
 0x145   : > { %v1224_v60 = vpop.f32.mrf.mxu0  ;;  %v1272_v61 = vpop.f32.mrf.mxu1 }
 0x146   : > { %955 = vst [vmem:[%s1792_s24 + $0x40] sm:$0xff] %v923_v58  ;;  %971 = vst [vmem:[%s1792_s24 + $0xc0] sm:$0xff] %v939_v59  ;;  %v1225_v62 = vadd.f32 %v1224_v60, %v1223_v56  ;;  %v1273_v63 = vadd.f32 %v1272_v61, %v1271_v57 }
 0x147   : > { %v1226_v0 = vpop.f32.mrf.mxu0  ;;  %v1274_v1 = vpop.f32.mrf.mxu1 }
 0x148   : > { %v924_v2 = vadd.f32 %v1225_v62, %v1786_v51  ;;  %v940_v3 = vadd.f32 %v1273_v63, %v1786_v51 }
 0x149   : > { %v1227_v4 = vpop.f32.mrf.mxu0  ;;  %v1275_v5 = vpop.f32.mrf.mxu1 }
 0x14a   : > { %956 = vst [vmem:[%s1792_s24 + $0x48] sm:$0xff] %v924_v2  ;;  %972 = vst [vmem:[%s1792_s24 + $0xc8] sm:$0xff] %v940_v3  ;;  %v1228_v6 = vadd.f32 %v1227_v4, %v1226_v0  ;;  %v1276_v7 = vadd.f32 %v1275_v5, %v1274_v1 }
 0x14b   : > { %v1229_v8 = vpop.f32.mrf.mxu0  ;;  %v1277_v9 = vpop.f32.mrf.mxu1 }
 0x14c   : > { %v925_v10 = vadd.f32 %v1228_v6, %v1786_v51  ;;  %v941_v11 = vadd.f32 %v1276_v7, %v1786_v51 }
 0x14d   : > { %v1230_v12 = vpop.f32.mrf.mxu0  ;;  %v1278_v13 = vpop.f32.mrf.mxu1 }
 0x14e   : > { %957 = vst [vmem:[%s1792_s24 + $0x50] sm:$0xff] %v925_v10  ;;  %973 = vst [vmem:[%s1792_s24 + $0xd0] sm:$0xff] %v941_v11  ;;  %v1231_v14 = vadd.f32 %v1230_v12, %v1229_v8  ;;  %v1279_v15 = vadd.f32 %v1278_v13, %v1277_v9 }
 0x14f   : > { %v1232_v16 = vpop.f32.mrf.mxu0  ;;  %v1280_v17 = vpop.f32.mrf.mxu1 }
 0x150   : > { %v926_v18 = vadd.f32 %v1231_v14, %v1786_v51  ;;  %v942_v19 = vadd.f32 %v1279_v15, %v1786_v51 }
 0x151   : > { %v1233_v20 = vpop.f32.mrf.mxu0  ;;  %v1281_v21 = vpop.f32.mrf.mxu1 }
 0x152   : > { %958 = vst [vmem:[%s1792_s24 + $0x58] sm:$0xff] %v926_v18  ;;  %974 = vst [vmem:[%s1792_s24 + $0xd8] sm:$0xff] %v942_v19  ;;  %v1234_v22 = vadd.f32 %v1233_v20, %v1232_v16  ;;  %v1282_v23 = vadd.f32 %v1281_v21, %v1280_v17 }
 0x153   : > { %v1235_v24 = vpop.f32.mrf.mxu0  ;;  %v1283_v25 = vpop.f32.mrf.mxu1 }
 0x154   : > { %v927_v26 = vadd.f32 %v1234_v22, %v1786_v51  ;;  %v943_v27 = vadd.f32 %v1282_v23, %v1786_v51 }
 0x155   : > { %v1236_v28 = vpop.f32.mrf.mxu0  ;;  %v1284_v29 = vpop.f32.mrf.mxu1 }
 0x156   : > { %959 = vst [vmem:[%s1792_s24 + $0x60] sm:$0xff] %v927_v26  ;;  %975 = vst [vmem:[%s1792_s24 + $0xe0] sm:$0xff] %v943_v27  ;;  %v1237_v30 = vadd.f32 %v1236_v28, %v1235_v24  ;;  %v1285_v31 = vadd.f32 %v1284_v29, %v1283_v25 }
 0x157   : > { %v1238_v32 = vpop.f32.mrf.mxu0  ;;  %v1286_v33 = vpop.f32.mrf.mxu1 }
 0x158   : > { %v928_v34 = vadd.f32 %v1237_v30, %v1786_v51  ;;  %v944_v35 = vadd.f32 %v1285_v31, %v1786_v51 }
 0x159   : > { %v1239_v36 = vpop.f32.mrf.mxu0  ;;  %v1287_v37 = vpop.f32.mrf.mxu1 }
 0x15a   : > { %960 = vst [vmem:[%s1792_s24 + $0x68] sm:$0xff] %v928_v34  ;;  %976 = vst [vmem:[%s1792_s24 + $0xe8] sm:$0xff] %v944_v35  ;;  %v1240_v38 = vadd.f32 %v1239_v36, %v1238_v32  ;;  %v1288_v39 = vadd.f32 %v1287_v37, %v1286_v33 }
 0x15b   : > { %v1241_v40 = vpop.f32.mrf.mxu0  ;;  %v1289_v41 = vpop.f32.mrf.mxu1 }
 0x15c   : > { %v929_v42 = vadd.f32 %v1240_v38, %v1786_v51  ;;  %v945_v43 = vadd.f32 %v1288_v39, %v1786_v51 }
 0x15d   : > { %v1242_v44 = vpop.f32.mrf.mxu0  ;;  %v1290_v45 = vpop.f32.mrf.mxu1 }
 0x15e   : > { %961 = vst [vmem:[%s1792_s24 + $0x70] sm:$0xff] %v929_v42  ;;  %977 = vst [vmem:[%s1792_s24 + $0xf0] sm:$0xff] %v945_v43  ;;  %v1243_v46 = vadd.f32 %v1242_v44, %v1241_v40  ;;  %v1291_v47 = vadd.f32 %v1290_v45, %v1289_v41 }
 0x160   : > { %v930_v48 = vadd.f32 %v1243_v46, %v1786_v51  ;;  %v946_v49 = vadd.f32 %v1291_v47, %v1786_v51 }
 0x162   : > { %962 = vst [vmem:[%s1792_s24 + $0x78] sm:$0xff] %v930_v48  ;;  %978 = vst [vmem:[%s1792_s24 + $0xf8] sm:$0xff] %v946_v49 }
 0x163   : > { %1518 = shalt.err (!%p1515_p5)
}
 0x164   : > { %s1519_s18 = scalar_lea.hbm %s1857_s6, 4096  ;;  %s1523_s30 = scalar_lea.hbm %s1914_s3, 8192 }
 0x165   : > { %p1520_p7 = scmp.ne.s32.totalorder %s1857_s6, %s1519_s18  ;;  %p1524_p9 = scmp.lt.s32.totalorder %s1857_s6, %s1914_s3 }
 0x166   : > { %p1525_p11 = scmp.lt.s32.totalorder %s1523_s30, %s1519_s18 }
 0x167   : > { %p1521_p6 = pnand %p1520_p7, %p1707_p13 }
 0x168   : > { %p1526_p10 = por %p1525_p11, %p1524_p9 }
 0x169   : > { %p1522_p4 = pneg %p1521_p6 }
 0x16b   : > { %p1527_p1 = pnand %p1526_p10, %p1522_p4 }
 0x16d   : > { %1530 = shalt.err (!%p1527_p1)
}
 0x16e   : > { %s1598_s24 = smov 128   ;;  %s1599_s29 = smov 8  }
 0x16f   : > { %1314 = dma.vmem_to_hbm [thread:$0]  (%p1707_p13), %s1859_s4, 4096, %s1857_s6, %s980_s15, %s1598_s24, %s1598_s24, %s1599_s29  }
 0x170 PF: > { %s1009_s21 = sand.u32 1, %s1569_s12   ;;  %p1926_p8 = scmp.ne.s32.totalorder %s1919_s23, 0 }
 0x171   : > { %p1927_p12 = scmp.ge.s32.totalorder %s1589_s17, 2  ;;  %s1010_s5 = scalar_lea.sflag [#allocation5], %s1009_s21 }
 0x173   : > { %p1325_p0 = pnand %p1927_p12, %p1926_p8 }
 0x175   : > { %p1326_p2 = pneg %p1325_p0 }
 0x177   : > { %1564 = dma.done.wait (%p1326_p2), %s1010_s5, 4096  }
 0x178   : > { %1566 = vsyncadd (%p1326_p2), %s1010_s5, 4294963200  ;;  %s20_s17 = sadd.s32 1, %s1589_s17   ;;  %s1928_s12 = smov %s1573_s13 }
 0x179   : > { %p17_p3 = scmp.ge.s32.totalorder %s20_s17, 4   ;;  %s1929_s13 = smov %s1577_s14 }
 0x17a   : > { %s1930_s14 = smov %s1716_s19  ;;  %s1931_s15 = smov %s1585_s16 }
 0x17b   : > { %s1932_s16 = smov %s1934_s28  ;;  %19 = sbr.rel (!%p17_p3) target bundleno = 7 (0x7), region = 93 }
 0x180   :  { %1015 = vsyncpa [#allocation4], 1 }
 0x181   :  { %1017 = vsyncpa [#allocation4 + $0x1], 1 }
 0x182   :  { %1018 = vsyncpa [#allocation7], 1 }
 0x183   :  { %1019 = vsyncpa [#allocation5], 1 }
 0x184   :  { %1021 = vsyncpa [#allocation5 + $0x1], 1 }

</bundles_post_ra>
